<compile_context>
chip_gen: v7x
topology: tpu7x:2x2x1
jax: 0.10.0
libtpu: 0.0.40
codegen_flags: <defaults>
</compile_context>

<pallas_src>
import math

import jax
import jax.numpy as jnp
from jax.experimental import pallas as pl
from jax.experimental.pallas import tpu as pltpu

_SQRT_HALF = 1.0 / math.sqrt(2.0)


def _gelu(x):
    # Exact (erf-based) GELU, matching torch.nn.GELU() default.
    return 0.5 * x * (1.0 + jax.lax.erf(x * _SQRT_HALF))


def _mstf_kernel(x_ref, w_ref, t_ref, fw_ref, gw_ref, o_ref, y_sc, p_sc):
    """One (batch, NT-tile) grid step.

    x_ref : (3C, TILE)   f32   channel-stacked input tile (lane-dense)
    w_ref : (3C, 3C)     bf16  block-diagonal conv weight, BN scale folded in
    t_ref : (3C, 1)      f32   folded conv-bias + BN shift
    fw_ref: (R, 3C)      f32   fc1 weight (no bias)
    gw_ref: (3, R)       f32   fc2 weight (no bias)
    o_ref : (C, NT)      f32   output slab, resident across the NT-tile axis
    y_sc  : (3, C, NT)   bf16  resident enhanced-branch activations
    p_sc  : (3C, 1)      f32   running spatial sum (global average pool)
    """
    C3, TILE = x_ref.shape
    C = C3 // 3
    NT = o_ref.shape[1]
    kt = pl.program_id(1)
    off = pl.multiple_of(kt * TILE, TILE)

    x = x_ref[...]                                                # (3C, TILE) f32
    # Residual from static sublane slices; stash it in the resident output slab.
    o_ref[:, pl.ds(off, TILE)] = (x[0:C] + x[C:2 * C] + x[2 * C:3 * C]) * (1.0 / 3.0)

    # Fused 1x1 convs: one block-diagonal (3C,3C) matmul (BN scale already
    # folded into the rows), bf16 MXU inputs, f32 accumulation.
    # TODO(synk): switch to three per-branch (C,C)@(C,TILE) matmuls once 3C
    # exceeds the MXU contraction width (128 v5e / 256 v6e+) to avoid 3x FLOPs.
    y = jnp.dot(w_ref[...], x.astype(jnp.bfloat16),
                preferred_element_type=jnp.float32)               # (3C, TILE)
    y = _gelu(y + t_ref[...])                                     # folded BN shift

    # Keep enhanced activations resident (bf16) and accumulate the pooled sum.
    y_sc[0, :, pl.ds(off, TILE)] = y[0:C].astype(jnp.bfloat16)
    y_sc[1, :, pl.ds(off, TILE)] = y[C:2 * C].astype(jnp.bfloat16)
    y_sc[2, :, pl.ds(off, TILE)] = y[2 * C:3 * C].astype(jnp.bfloat16)

    @pl.when(kt == 0)
    def _():
        p_sc[...] = jnp.zeros_like(p_sc)

    p_sc[...] += jnp.sum(y, axis=1, keepdims=True)

    # Last tile of this batch element: squeeze-excitation + weighted sum.
    @pl.when(kt == pl.num_programs(1) - 1)
    def _():
        f = p_sc[...] * (1.0 / NT)                                # (3C, 1) pooled mean
        # Tiny serialized matvecs run once per batch element: accepted as a
        # fixed-latency epilogue tail (not worth moving off the MXU).
        h = _gelu(jnp.dot(fw_ref[...], f,
                          preferred_element_type=jnp.float32))    # (R, 1)
        logits = jnp.dot(gw_ref[...], h,
                         preferred_element_type=jnp.float32)      # (3, 1)
        m = jnp.max(logits, axis=0, keepdims=True)
        e = jnp.exp(logits - m)
        wgt = e / jnp.sum(e, axis=0, keepdims=True)               # (3, 1) softmax

        # out = sum_i w_i * y_i + residual (residual already sits in o_ref).
        # TODO(synk): nn.Dropout(0.1) is identity in eval mode; training-mode
        # random masking is not implemented here.
        o_ref[...] = (y_sc[0].astype(jnp.float32) * wgt[0:1, 0:1]
                      + y_sc[1].astype(jnp.float32) * wgt[1:2, 0:1]
                      + y_sc[2].astype(jnp.float32) * wgt[2:3, 0:1]
                      + o_ref[...])


def init_raw_params(key, in_channels, reduction_ratio=4):
    """Deterministic synthetic parameters in the original (PyTorch) layout."""
    C = in_channels
    R = max(1, C // reduction_ratio)
    ks = jax.random.split(key, 8)
    return {
        "conv_w": 0.2 * jax.random.normal(ks[0], (3, C, C), jnp.float32),   # (branch, Cout, Cin)
        "conv_b": 0.1 * jax.random.normal(ks[1], (3, C), jnp.float32),
        "bn_gamma": 1.0 + 0.1 * jax.random.normal(ks[2], (3, C), jnp.float32),
        "bn_beta": 0.1 * jax.random.normal(ks[3], (3, C), jnp.float32),
        "bn_mean": 0.1 * jax.random.normal(ks[4], (3, C), jnp.float32),
        "bn_var": jax.random.uniform(ks[5], (3, C), jnp.float32, 0.5, 1.5),
        "fc1_w": 0.3 * jax.random.normal(ks[6], (R, 3 * C), jnp.float32),   # Linear(3C -> R)
        "fc2_w": 0.3 * jax.random.normal(ks[7], (3, R), jnp.float32),       # Linear(R -> 3)
    }


def fold_params(raw, eps=1e-5):
    """Fold conv bias + eval-mode BN.  The per-channel BN scale is folded INTO
    the conv rows in f32; a single f32->bf16 cast happens at the end."""
    conv_w = raw["conv_w"]
    C = conv_w.shape[-1]
    a = raw["bn_gamma"] / jnp.sqrt(raw["bn_var"] + eps)                      # (3, C)
    shift = ((raw["conv_b"] - raw["bn_mean"]) * a
             + raw["bn_beta"]).reshape(3 * C, 1)                             # (3C, 1)
    w_scaled = conv_w * a[:, :, None]                                        # row-scale in f32
    w_bd = jnp.zeros((3 * C, 3 * C), jnp.float32)
    for i in range(3):
        w_bd = w_bd.at[i * C:(i + 1) * C, i * C:(i + 1) * C].set(w_scaled[i])
    return {
        "w_bd": w_bd.astype(jnp.bfloat16),   # MXU-native bf16 weight (f32 accum in-kernel)
        "shift": shift,
        "fw": raw["fc1_w"],                  # (R, 3C)
        "gw": raw["fc2_w"],                  # (3, R)
    }


def _pick_tile_nt(nt, max_tile=512):
    """Largest multiple-of-128 divisor of nt (<= max_tile), preferring >=2
    tiles so each TensorCore gets multiple pipeline steps; falls back to a
    single full-width tile when nt is not 128-aligned."""
    cands = [t for t in range(128, min(nt, max_tile) + 1, 128) if nt % t == 0]
    if not cands:
        return nt
    multi = [t for t in cands if nt // t >= 2]
    return max(multi) if multi else max(cands)


def improved_mstf(x1, x2, x3, params):
    B, C, N, T = x1.shape
    NT = N * T
    R = params["fw"].shape[0]
    C3 = 3 * C

    # Pre-stack the three branches into one (B, 3C, NT) HBM array: one input
    # DMA stream, no in-kernel concatenate.  The reshapes are free; NT stays
    # on the (lane-dense) minor axis.
    x_cat = jnp.concatenate(
        [x1.reshape(B, C, NT), x2.reshape(B, C, NT), x3.reshape(B, C, NT)], axis=1)

    TILE_NT = _pick_tile_nt(NT)
    KT = NT // TILE_NT

    def full(shape):
        return pl.BlockSpec(shape, lambda b, kt: (0,) * len(shape))

    in_specs = [
        pl.BlockSpec((None, C3, TILE_NT), lambda b, kt: (b, 0, kt)),
        full((C3, C3)), full((C3, 1)), full((R, C3)), full((3, R)),
    ]
    out_spec = pl.BlockSpec((None, C, NT), lambda b, kt: (b, 0, 0))

    # Real pipelined working set: double-buffered input tiles + double-buffered
    # resident output slab + resident bf16 y scratch + small weights + temps.
    bytes_in = 2 * C3 * TILE_NT * 4
    bytes_out = 2 * C * NT * 4
    bytes_y = C3 * NT * 2
    bytes_w = 2 * (C3 * C3 * 2 + C3 * 4 + R * C3 * 4 + 3 * R * 4)
    bytes_tmp = 6 * C3 * TILE_NT * 4 + 3 * C * NT * 4
    working_set = bytes_in + bytes_out + bytes_y + bytes_w + bytes_tmp
    try:
        vmem_cap = int(pltpu.get_tpu_info().vmem_capacity_bytes)
    except Exception:
        vmem_cap = 64 * 1024 * 1024          # conservative (v7x per-core) fallback
    assert 2 * working_set <= int(0.9 * vmem_cap), (
        "TODO(synk): for shapes this large, stream y from HBM in a second pass "
        "instead of keeping it resident in VMEM")
    vmem_limit = int(min(0.75 * vmem_cap, max(32 << 20, 2 * working_set)))

    cost = pl.CostEstimate(
        flops=int(2 * B * C3 * C3 * NT + 2 * B * (R * C3 + 3 * R) + 8 * B * C3 * NT),
        transcendentals=int(B * (C3 * NT + R + 3)),
        bytes_accessed=int(4 * B * C3 * NT + 4 * B * C * NT
                           + 2 * C3 * C3 + 4 * (C3 + R * C3 + 3 * R)),
    )

    out_flat = pl.pallas_call(
        _mstf_kernel,
        out_shape=jax.ShapeDtypeStruct((B, C, NT), jnp.float32),
        grid_spec=pltpu.PrefetchScalarGridSpec(
            num_scalar_prefetch=0,
            grid=(B, KT),
            in_specs=in_specs,
            out_specs=out_spec,
            scratch_shapes=[pltpu.VMEM((3, C, NT), jnp.bfloat16),
                            pltpu.VMEM((C3, 1), jnp.float32)]),
        compiler_params=pltpu.CompilerParams(
            dimension_semantics=("parallel", "arbitrary"),
            vmem_limit_bytes=vmem_limit),
        cost_estimate=cost,
    )(x_cat, params["w_bd"], params["shift"], params["fw"], params["gw"])

    return out_flat.reshape(B, C, N, T)


def reference_torch(x1, x2, x3, raw, eps=1e-5):
    """Pure-JAX, full-f32 mirror of the PyTorch forward (eval mode)."""
    def branch(x, i):
        y = jnp.einsum("oc,bcnt->bont", raw["conv_w"][i], x)
        y = y + raw["conv_b"][i][None, :, None, None]
        y = (y - raw["bn_mean"][i][None, :, None, None]) * (
            raw["bn_gamma"][i][None, :, None, None]
            / jnp.sqrt(raw["bn_var"][i][None, :, None, None] + eps))
        y = y + raw["bn_beta"][i][None, :, None, None]
        return _gelu(y)

    y1, y2, y3 = branch(x1, 0), branch(x2, 1), branch(x3, 2)
    f = jnp.concatenate([y.mean(axis=(2, 3)) for y in (y1, y2, y3)], axis=1)  # (B, 3C)
    h = _gelu(f @ raw["fc1_w"].T)                                             # (B, R)
    logits = h @ raw["fc2_w"].T                                               # (B, 3)
    w = jax.nn.softmax(logits, axis=1)
    out = (y1 * w[:, 0, None, None, None] + y2 * w[:, 1, None, None, None]
           + y3 * w[:, 2, None, None, None])
    return out + (x1 + x2 + x3) / 3.0


def reference_folded(x1, x2, x3, kp):
    """Pure-JAX mirror of the kernel numerics (scale-folded bf16 weight, bf16
    matmul inputs, bf16-resident enhanced activations, f32 residual)."""
    B, C, N, T = x1.shape
    NT = N * T
    xs = jnp.concatenate([x.reshape(B, C, NT) for x in (x1, x2, x3)], axis=1)  # (B, 3C, NT)
    y = jnp.einsum("oc,bcn->bon", kp["w_bd"], xs.astype(jnp.bfloat16),
                   preferred_element_type=jnp.float32)
    y = _gelu(y + kp["shift"][None])
    f = jnp.mean(y, axis=2)                                                    # (B, 3C)
    h = _gelu(f @ kp["fw"].T)                                                  # (B, R)
    logits = h @ kp["gw"].T                                                    # (B, 3)
    w = jax.nn.softmax(logits, axis=1)
    yb = y.astype(jnp.bfloat16).astype(jnp.float32).reshape(B, 3, C, NT)
    out = jnp.einsum("bs,bscn->bcn", w, yb)
    out = out + (x1 + x2 + x3).reshape(B, C, NT) / 3.0
    return out.reshape(B, C, N, T)


if __name__ == "__main__":
    key = jax.random.PRNGKey(0)
    k1, k2, k3, kp = jax.random.split(key, 4)
    B, C, N, T = 2, 8, 16, 16
    x1 = jax.random.normal(k1, (B, C, N, T), jnp.float32)
    x2 = jax.random.normal(k2, (B, C, N, T), jnp.float32)
    x3 = jax.random.normal(k3, (B, C, N, T), jnp.float32)
    raw = init_raw_params(kp, C, reduction_ratio=4)
    params = fold_params(raw)

    out = jax.block_until_ready(improved_mstf(x1, x2, x3, params))
    assert out.shape == (B, C, N, T), out.shape

    # (1) Tight check against a pure-JAX reference mirroring the kernel's
    #     numerics (folded BN/scale, bf16 matmul inputs, bf16 y residency).
    ref_mirror = jax.block_until_ready(reference_folded(x1, x2, x3, params))
    err_mirror = float(jnp.max(jnp.abs(out - ref_mirror)))
    assert err_mirror < 2e-3, err_mirror

    # (2) Bounded-deviation check against the exact f32 PyTorch-eval
    #     semantics; deviation sources are the bf16 weight/activation casts.
    ref_exact = jax.block_until_ready(reference_torch(x1, x2, x3, raw))
    err_exact = float(jnp.max(jnp.abs(out - ref_exact)))
    assert err_exact < 1e-1, err_exact

    print("KERNEL_OK")
</pallas_src>

<mosaic_0001>
module attributes {stable_mosaic.version = 11 : i64} {
  func.func @_mstf_kernel(%arg0: i32, %arg1: i32, %arg2: memref<1x24x128xf32, #tpu.memory_space<vmem>>, %arg3: memref<24x24xbf16, #tpu.memory_space<vmem>>, %arg4: memref<24x1xf32, #tpu.memory_space<vmem>>, %arg5: memref<2x24xf32, #tpu.memory_space<vmem>>, %arg6: memref<3x2xf32, #tpu.memory_space<vmem>>, %arg7: memref<1x8x256xf32, #tpu.memory_space<vmem>>, %arg8: memref<3x8x256xbf16, #tpu.memory_space<vmem>>, %arg9: memref<24x1xf32, #tpu.memory_space<vmem>>) attributes {dimension_semantics = [#tpu.dimension_semantics<parallel>, #tpu.dimension_semantics<arbitrary>], iteration_bounds = array<i64: 2, 2>, scalar_prefetch = 0 : i64, scratch_operands = 2 : i64, tpu.core_type = #tpu.core_type<tc>, window_params = [{transform_indices = @transform_0, window_bounds = array<i64: 1, 24, 128>}, {pipeline_mode = #tpu.pipeline_mode<synchronous>, transform_indices = @transform_1, window_bounds = array<i64: 24, 24>}, {pipeline_mode = #tpu.pipeline_mode<synchronous>, transform_indices = @transform_2, window_bounds = array<i64: 24, 1>}, {pipeline_mode = #tpu.pipeline_mode<synchronous>, transform_indices = @transform_3, window_bounds = array<i64: 2, 24>}, {pipeline_mode = #tpu.pipeline_mode<synchronous>, transform_indices = @transform_4, window_bounds = array<i64: 3, 2>}, {transform_indices = @transform_5, window_bounds = array<i64: 1, 8, 256>}]} {
    %c128_i32 = arith.constant 128 : i32
    %0 = arith.muli %arg1, %c128_i32 : i32
    %1 = tpu.assume_multiple %0, 128 : i32
    %c0 = arith.constant 0 : index
    %c0_0 = arith.constant 0 : index
    %c0_1 = arith.constant 0 : index
    %2 = vector.load %arg2[%c0, %c0_0, %c0_1] : memref<1x24x128xf32, #tpu.memory_space<vmem>>, vector<1x24x128xf32>
    %3 = vector.shape_cast %2 : vector<1x24x128xf32> to vector<24x128xf32>
    %4 = vector.extract_strided_slice %3 {offsets = [0, 0], sizes = [8, 128], strides = [1, 1]} : vector<24x128xf32> to vector<8x128xf32>
    %5 = vector.extract_strided_slice %3 {offsets = [8, 0], sizes = [8, 128], strides = [1, 1]} : vector<24x128xf32> to vector<8x128xf32>
    %6 = arith.addf %4, %5 : vector<8x128xf32>
    %7 = vector.extract_strided_slice %3 {offsets = [16, 0], sizes = [8, 128], strides = [1, 1]} : vector<24x128xf32> to vector<8x128xf32>
    %8 = arith.addf %6, %7 : vector<8x128xf32>
    %cst = arith.constant 0.333333343 : f32
    %9 = vector.broadcast %cst : f32 to vector<8x128xf32>
    %10 = arith.mulf %8, %9 : vector<8x128xf32>
    %c0_2 = arith.constant 0 : index
    %c0_3 = arith.constant 0 : index
    %11 = arith.index_cast %1 : i32 to index
    %12 = vector.load %arg7[%c0_2, %c0_3, %11] : memref<1x8x256xf32, #tpu.memory_space<vmem>>, vector<1x8x128xf32>
    %13 = vector.shape_cast %12 : vector<1x8x128xf32> to vector<8x128xf32>
    %14 = vector.shape_cast %10 : vector<8x128xf32> to vector<1x8x128xf32>
    tpu.vector_store %arg7[%c0_2, %c0_3, %11], %14 {strides = array<i32>} : memref<1x8x256xf32, #tpu.memory_space<vmem>>, vector<1x8x128xf32>,
    %c0_4 = arith.constant 0 : index
    %c0_5 = arith.constant 0 : index
    %15 = vector.load %arg3[%c0_4, %c0_5] : memref<24x24xbf16, #tpu.memory_space<vmem>>, vector<24x24xbf16>
    %16 = arith.truncf %3 : vector<24x128xf32> to vector<24x128xbf16>
    %cst_6 = arith.constant dense<0.000000e+00> : vector<24x128xf32>
    %17 = tpu.matmul %15, %16, %cst_6 {dimension_numbers = #tpu.dot_dimension_numbers<[1], [0], [0], [1], [0, 0, 1, 1], [], []>} : vector<24x24xbf16>, vector<24x128xbf16>, vector<24x128xf32> -> vector<24x128xf32>
    %c0_7 = arith.constant 0 : index
    %c0_8 = arith.constant 0 : index
    %18 = vector.load %arg4[%c0_7, %c0_8] : memref<24x1xf32, #tpu.memory_space<vmem>>, vector<24x1xf32>
    %19 = vector.broadcast %18 : vector<24x1xf32> to vector<24x128xf32>
    %20 = arith.addf %17, %19 : vector<24x128xf32>
    %cst_9 = arith.constant 5.000000e-01 : f32
    %21 = vector.broadcast %cst_9 : f32 to vector<24x128xf32>
    %22 = arith.mulf %21, %20 : vector<24x128xf32>
    %cst_10 = arith.constant 0.707106769 : f32
    %23 = vector.broadcast %cst_10 : f32 to vector<24x128xf32>
    %24 = arith.mulf %20, %23 : vector<24x128xf32>
    %25 = math.erf %24 : vector<24x128xf32>
    %cst_11 = arith.constant 1.000000e+00 : f32
    %26 = vector.broadcast %cst_11 : f32 to vector<24x128xf32>
    %27 = arith.addf %26, %25 : vector<24x128xf32>
    %28 = arith.mulf %22, %27 : vector<24x128xf32>
    %29 = vector.extract_strided_slice %28 {offsets = [0, 0], sizes = [8, 128], strides = [1, 1]} : vector<24x128xf32> to vector<8x128xf32>
    %30 = arith.truncf %29 : vector<8x128xf32> to vector<8x128xbf16>
    %c0_12 = arith.constant 0 : index
    %c0_13 = arith.constant 0 : index
    %31 = arith.index_cast %1 : i32 to index
    %32 = vector.load %arg8[%c0_12, %c0_13, %31] : memref<3x8x256xbf16, #tpu.memory_space<vmem>>, vector<1x8x128xbf16>
    %33 = vector.shape_cast %32 : vector<1x8x128xbf16> to vector<8x128xbf16>
    %34 = vector.shape_cast %30 : vector<8x128xbf16> to vector<1x8x128xbf16>
    tpu.vector_store %arg8[%c0_12, %c0_13, %31], %34 {strides = array<i32>} : memref<3x8x256xbf16, #tpu.memory_space<vmem>>, vector<1x8x128xbf16>,
    %35 = vector.extract_strided_slice %28 {offsets = [8, 0], sizes = [8, 128], strides = [1, 1]} : vector<24x128xf32> to vector<8x128xf32>
    %36 = arith.truncf %35 : vector<8x128xf32> to vector<8x128xbf16>
    %c1 = arith.constant 1 : index
    %c0_14 = arith.constant 0 : index
    %37 = arith.index_cast %1 : i32 to index
    %38 = vector.load %arg8[%c1, %c0_14, %37] : memref<3x8x256xbf16, #tpu.memory_space<vmem>>, vector<1x8x128xbf16>
    %39 = vector.shape_cast %38 : vector<1x8x128xbf16> to vector<8x128xbf16>
    %40 = vector.shape_cast %36 : vector<8x128xbf16> to vector<1x8x128xbf16>
    tpu.vector_store %arg8[%c1, %c0_14, %37], %40 {strides = array<i32>} : memref<3x8x256xbf16, #tpu.memory_space<vmem>>, vector<1x8x128xbf16>,
    %41 = vector.extract_strided_slice %28 {offsets = [16, 0], sizes = [8, 128], strides = [1, 1]} : vector<24x128xf32> to vector<8x128xf32>
    %42 = arith.truncf %41 : vector<8x128xf32> to vector<8x128xbf16>
    %c2 = arith.constant 2 : index
    %c0_15 = arith.constant 0 : index
    %43 = arith.index_cast %1 : i32 to index
    %44 = vector.load %arg8[%c2, %c0_15, %43] : memref<3x8x256xbf16, #tpu.memory_space<vmem>>, vector<1x8x128xbf16>
    %45 = vector.shape_cast %44 : vector<1x8x128xbf16> to vector<8x128xbf16>
    %46 = vector.shape_cast %42 : vector<8x128xbf16> to vector<1x8x128xbf16>
    tpu.vector_store %arg8[%c2, %c0_15, %43], %46 {strides = array<i32>} : memref<3x8x256xbf16, #tpu.memory_space<vmem>>, vector<1x8x128xbf16>,
    %c0_i32 = arith.constant 0 : i32
    %47 = arith.cmpi eq, %arg1, %c0_i32 : i32
    %48 = arith.extui %47 : i1 to i32
    %c0_i32_16 = arith.constant 0 : i32
    %49 = arith.cmpi ne, %48, %c0_i32_16 : i32
    scf.if %49 {
      %cst_23 = arith.constant 0.000000e+00 : f32
      %58 = vector.broadcast %cst_23 : f32 to vector<24x1xf32>
      %c0_24 = arith.constant 0 : index
      %c0_25 = arith.constant 0 : index
      %59 = vector.load %arg9[%c0_24, %c0_25] : memref<24x1xf32, #tpu.memory_space<vmem>>, vector<24x1xf32>
      tpu.vector_store %arg9[%c0_24, %c0_25], %58 {strides = array<i32>} : memref<24x1xf32, #tpu.memory_space<vmem>>, vector<24x1xf32>,
    } else {
    }
    %c0_17 = arith.constant 0 : index
    %c0_18 = arith.constant 0 : index
    %50 = vector.load %arg9[%c0_17, %c0_18] : memref<24x1xf32, #tpu.memory_space<vmem>>, vector<24x1xf32>
    %cst_19 = arith.constant dense<0.000000e+00> : vector<24xf32>
    %51 = vector.multi_reduction <add>, %28, %cst_19 [1] : vector<24x128xf32> to vector<24xf32>
    %52 = vector.shape_cast %51 : vector<24xf32> to vector<24x1xf32>
    %53 = arith.addf %50, %52 : vector<24x1xf32>
    %c0_20 = arith.constant 0 : index
    %c0_21 = arith.constant 0 : index
    %54 = vector.load %arg9[%c0_20, %c0_21] : memref<24x1xf32, #tpu.memory_space<vmem>>, vector<24x1xf32>
    tpu.vector_store %arg9[%c0_20, %c0_21], %53 {strides = array<i32>} : memref<24x1xf32, #tpu.memory_space<vmem>>, vector<24x1xf32>,
    %c1_i32 = arith.constant 1 : i32
    %55 = arith.cmpi eq, %arg1, %c1_i32 : i32
    %56 = arith.extui %55 : i1 to i32
    %c0_i32_22 = arith.constant 0 : i32
    %57 = arith.cmpi ne, %56, %c0_i32_22 : i32
    scf.if %57 {
      %c0_23 = arith.constant 0 : index
      %c0_24 = arith.constant 0 : index
      %58 = vector.load %arg9[%c0_23, %c0_24] : memref<24x1xf32, #tpu.memory_space<vmem>>, vector<24x1xf32>
      %cst_25 = arith.constant 3.906250e-03 : f32
      %59 = vector.broadcast %cst_25 : f32 to vector<24x1xf32>
      %60 = arith.mulf %58, %59 : vector<24x1xf32>
      %c0_26 = arith.constant 0 : index
      %c0_27 = arith.constant 0 : index
      %61 = vector.load %arg5[%c0_26, %c0_27] : memref<2x24xf32, #tpu.memory_space<vmem>>, vector<2x24xf32>
      %cst_28 = arith.constant dense<0.000000e+00> : vector<2x1xf32>
      %62 = tpu.matmul %61, %60, %cst_28 {dimension_numbers = #tpu.dot_dimension_numbers<[1], [0], [0], [1], [0, 0, 1, 1], [], []>} : vector<2x24xf32>, vector<24x1xf32>, vector<2x1xf32> -> vector<2x1xf32>
      %cst_29 = arith.constant 5.000000e-01 : f32
      %63 = vector.broadcast %cst_29 : f32 to vector<2x1xf32>
      %64 = arith.mulf %63, %62 : vector<2x1xf32>
      %cst_30 = arith.constant 0.707106769 : f32
      %65 = vector.broadcast %cst_30 : f32 to vector<2x1xf32>
      %66 = arith.mulf %62, %65 : vector<2x1xf32>
      %67 = math.erf %66 : vector<2x1xf32>
      %cst_31 = arith.constant 1.000000e+00 : f32
      %68 = vector.broadcast %cst_31 : f32 to vector<2x1xf32>
      %69 = arith.addf %68, %67 : vector<2x1xf32>
      %70 = arith.mulf %64, %69 : vector<2x1xf32>
      %c0_32 = arith.constant 0 : index
      %c0_33 = arith.constant 0 : index
      %71 = vector.load %arg6[%c0_32, %c0_33] : memref<3x2xf32, #tpu.memory_space<vmem>>, vector<3x2xf32>
      %cst_34 = arith.constant dense<0.000000e+00> : vector<3x1xf32>
      %72 = tpu.matmul %71, %70, %cst_34 {dimension_numbers = #tpu.dot_dimension_numbers<[1], [0], [0], [1], [0, 0, 1, 1], [], []>} : vector<3x2xf32>, vector<2x1xf32>, vector<3x1xf32> -> vector<3x1xf32>
      %cst_35 = arith.constant dense<0xFF800000> : vector<1xf32>
      %73 = vector.multi_reduction <maximumf>, %72, %cst_35 [0] : vector<3x1xf32> to vector<1xf32>
      %74 = vector.shape_cast %73 : vector<1xf32> to vector<1x1xf32>
      %75 = vector.broadcast %74 : vector<1x1xf32> to vector<3x1xf32>
      %76 = arith.subf %72, %75 : vector<3x1xf32>
      %77 = math.exp %76 : vector<3x1xf32>
      %cst_36 = arith.constant dense<0.000000e+00> : vector<1xf32>
      %78 = vector.multi_reduction <add>, %77, %cst_36 [0] : vector<3x1xf32> to vector<1xf32>
      %79 = vector.shape_cast %78 : vector<1xf32> to vector<1x1xf32>
      %80 = vector.broadcast %79 : vector<1x1xf32> to vector<3x1xf32>
      %81 = arith.divf %77, %80 : vector<3x1xf32>
      %c0_37 = arith.constant 0 : index
      %c0_38 = arith.constant 0 : index
      %c0_39 = arith.constant 0 : index
      %82 = vector.load %arg8[%c0_37, %c0_38, %c0_39] : memref<3x8x256xbf16, #tpu.memory_space<vmem>>, vector<1x8x256xbf16>
      %83 = vector.shape_cast %82 : vector<1x8x256xbf16> to vector<8x256xbf16>
      %84 = arith.extf %83 : vector<8x256xbf16> to vector<8x256xf32>
      %85 = vector.extract_strided_slice %81 {offsets = [0, 0], sizes = [1, 1], strides = [1, 1]} : vector<3x1xf32> to vector<1x1xf32>
      %86 = vector.broadcast %85 : vector<1x1xf32> to vector<8x256xf32>
      %87 = arith.mulf %84, %86 : vector<8x256xf32>
      %c1_40 = arith.constant 1 : index
      %c0_41 = arith.constant 0 : index
      %c0_42 = arith.constant 0 : index
      %88 = vector.load %arg8[%c1_40, %c0_41, %c0_42] : memref<3x8x256xbf16, #tpu.memory_space<vmem>>, vector<1x8x256xbf16>
      %89 = vector.shape_cast %88 : vector<1x8x256xbf16> to vector<8x256xbf16>
      %90 = arith.extf %89 : vector<8x256xbf16> to vector<8x256xf32>
      %91 = vector.extract_strided_slice %81 {offsets = [1, 0], sizes = [1, 1], strides = [1, 1]} : vector<3x1xf32> to vector<1x1xf32>
      %92 = vector.broadcast %91 : vector<1x1xf32> to vector<8x256xf32>
      %93 = arith.mulf %90, %92 : vector<8x256xf32>
      %94 = arith.addf %87, %93 : vector<8x256xf32>
      %c2_43 = arith.constant 2 : index
      %c0_44 = arith.constant 0 : index
      %c0_45 = arith.constant 0 : index
      %95 = vector.load %arg8[%c2_43, %c0_44, %c0_45] : memref<3x8x256xbf16, #tpu.memory_space<vmem>>, vector<1x8x256xbf16>
      %96 = vector.shape_cast %95 : vector<1x8x256xbf16> to vector<8x256xbf16>
      %97 = arith.extf %96 : vector<8x256xbf16> to vector<8x256xf32>
      %98 = vector.extract_strided_slice %81 {offsets = [2, 0], sizes = [1, 1], strides = [1, 1]} : vector<3x1xf32> to vector<1x1xf32>
      %99 = vector.broadcast %98 : vector<1x1xf32> to vector<8x256xf32>
      %100 = arith.mulf %97, %99 : vector<8x256xf32>
      %101 = arith.addf %94, %100 : vector<8x256xf32>
      %c0_46 = arith.constant 0 : index
      %c0_47 = arith.constant 0 : index
      %c0_48 = arith.constant 0 : index
      %102 = vector.load %arg7[%c0_46, %c0_47, %c0_48] : memref<1x8x256xf32, #tpu.memory_space<vmem>>, vector<1x8x256xf32>
      %103 = vector.shape_cast %102 : vector<1x8x256xf32> to vector<8x256xf32>
      %104 = arith.addf %101, %103 : vector<8x256xf32>
      %c0_49 = arith.constant 0 : index
      %c0_50 = arith.constant 0 : index
      %c0_51 = arith.constant 0 : index
      %105 = vector.load %arg7[%c0_49, %c0_50, %c0_51] : memref<1x8x256xf32, #tpu.memory_space<vmem>>, vector<1x8x256xf32>
      %106 = vector.shape_cast %105 : vector<1x8x256xf32> to vector<8x256xf32>
      %107 = vector.shape_cast %104 : vector<8x256xf32> to vector<1x8x256xf32>
      tpu.vector_store %arg7[%c0_49, %c0_50, %c0_51], %107 {strides = array<i32>} : memref<1x8x256xf32, #tpu.memory_space<vmem>>, vector<1x8x256xf32>,
    } else {
    }
    return
  }
  func.func @transform_0(%arg0: i32, %arg1: i32) -> (i32, i32, i32) {
    %c0_i32 = arith.constant 0 : i32
    %c0_i32_0 = arith.constant 0 : i32
    return %arg0, %c0_i32, %arg1 : i32, i32, i32
  }
  func.func @transform_1(%arg0: i32, %arg1: i32) -> (i32, i32) {
    %c0_i32 = arith.constant 0 : i32
    %c0_i32_0 = arith.constant 0 : i32
    %c0_i32_1 = arith.constant 0 : i32
    return %c0_i32, %c0_i32_0 : i32, i32
  }
  func.func @transform_2(%arg0: i32, %arg1: i32) -> (i32, i32) {
    %c0_i32 = arith.constant 0 : i32
    %c0_i32_0 = arith.constant 0 : i32
    %c0_i32_1 = arith.constant 0 : i32
    return %c0_i32, %c0_i32_0 : i32, i32
  }
  func.func @transform_3(%arg0: i32, %arg1: i32) -> (i32, i32) {
    %c0_i32 = arith.constant 0 : i32
    %c0_i32_0 = arith.constant 0 : i32
    %c0_i32_1 = arith.constant 0 : i32
    return %c0_i32, %c0_i32_0 : i32, i32
  }
  func.func @transform_4(%arg0: i32, %arg1: i32) -> (i32, i32) {
    %c0_i32 = arith.constant 0 : i32
    %c0_i32_0 = arith.constant 0 : i32
    %c0_i32_1 = arith.constant 0 : i32
    return %c0_i32, %c0_i32_0 : i32, i32
  }
  func.func @transform_5(%arg0: i32, %arg1: i32) -> (i32, i32, i32) {
    %c0_i32 = arith.constant 0 : i32
    %c0_i32_0 = arith.constant 0 : i32
    %c0_i32_1 = arith.constant 0 : i32
    return %arg0, %c0_i32, %c0_i32_0 : i32, i32, i32
  }
}

</mosaic_0001>

<bundles_post_ra>
// kernel: tpu_custom_call.1
= control target key start
LH: loop header
LB: loop body
LE: loop exit
PB: predicated region body
PF: predicated region fallthrough
CT: control target
= control target key end

     0   :  { %10 = vsyncpa [#allocation5], 0  ;;  %s1397_s0 = inlined_call_operand.hbm [shape: f32[2,24,256], index: 0, kind: input, shape index: {}]   ;;  %s1398_s1 = inlined_call_operand.vmem [shape: bf16[24,24], index: 1, kind: input, shape index: {}]   ;;  %s1399_s2 = inlined_call_operand.vmem [shape: f32[24,1], index: 2, kind: input, shape index: {}]   ;;  %s1400_s3 = inlined_call_operand.vmem [shape: f32[2,24], index: 3, kind: input, shape index: {}]   ;;  %s1401_s4 = inlined_call_operand.vmem [shape: f32[3,2], index: 4, kind: input, shape index: {}]   ;;  %s1402_s5 = inlined_call_operand.hbm [shape: f32[2,8,256], index: 5, kind: output, shape index: {}]  }
   0x1   :  { %12 = vsyncpa [#allocation5 + $0x1], 0 }
   0x2   :  { %13 = vsyncpa [#allocation6], 0 }
   0x3   :  { %15 = vsyncpa [#allocation6 + $0x1], 0  ;;  %s1143_s18 = smov 0   ;;  %s1145_s19 = smov 0  }
   0x4   :  { %s1147_s20 = smov 0   ;;  %s1149_s21 = smov 0  }
   0x5   :  { %s1151_s22 = smov 0   ;;  %s1153_s23 = smov 0  }
   0x6   :  { %s1155_s24 = smov 0   ;;  %s1157_s25 = smov 0  }
   0x7   :  { %s1159_s26 = smov 0   ;;  %s1161_s27 = smov 0  }
   0x8   :  { %s1163_s28 = smov 0  }
   0x9 LB: > { %1407 = sst [smem:[#allocation10_spill]] %s1097_s27  ;;  %s749_s29 = sadd.s32 4294967295, %s1101_s28   ;;  %s1101_s28 = sphi %s1163_s28, %s21_s28   ;;  %s1097_s27 = sphi %s1161_s27, %s1423_s27   ;;  %s1093_s26 = sphi %s1159_s26, %s1431_s26   ;;  %s1089_s25 = sphi %s1157_s25, %s1421_s25   ;;  %s1085_s24 = sphi %s1155_s24, %s1430_s24   ;;  %s1081_s23 = sphi %s1153_s23, %s1429_s23   ;;  %s1077_s22 = sphi %s1151_s22, %s1428_s22   ;;  %s1073_s21 = sphi %s1149_s21, %s1427_s21   ;;  %s1069_s20 = sphi %s1147_s20, %s1426_s20   ;;  %s1065_s19 = sphi %s1145_s19, %s1425_s19   ;;  %s1061_s18 = sphi %s1143_s18, %s1424_s18  }
   0xa   : > { %s750_s30 = sadd.s32 4294967294, %s1101_s28   ;;  %s30_s6 = sadd.s32 1, %s1093_s26 }
   0xb   : > { %s33_s7 = sadd.s32 1, %s1097_s27  ;;  %p31_p0 = scmp.ge.s32.totalorder %s30_s6, 2 }
   0xc   : > { %s42_s8 = sadd.s32 1, %s1081_s23  ;;  %p49_p1 = scmp.ne.s32.totalorder %s1081_s23, %s1077_s22 }
   0xd   : > { %p50_p2 = scmp.eq.s32.totalorder %s1101_s28, 0  ;;  %s1433_s6 = smov (%p31_p0, %s30_s6), 0 }
   0xe   : > { %1408 = sst [smem:[#allocation11_spill]] %s1433_s6  ;;  %s1435_s7 = smov (!%p31_p0, %s33_s7), %s1097_s27 }
   0xf   : > { %s38_s9 = ssub.s32 %s1093_s26, %s1433_s6  ;;  %p1209_p3 = por %p50_p2, %p49_p1 }
  0x10   : > { %p35_p4 = scmp.ge.s32.totalorder %s1435_s7, 2  ;;  %p55_p5 = scmp.ne.s32.totalorder %s1077_s22, %s1073_s21 }
  0x11   : > { %p56_p6 = scmp.eq.s32.totalorder %s749_s29, 0  ;;  %s152_s11 = sadd.s32 1, %s1069_s20 }
  0x12   : > { %s1437_s7 = smov (%p35_p4, %s1435_s7), 0  ;;  %p162_p8 = scmp.ne.s32.totalorder %s1069_s20, %s1065_s19 }
  0x13   : > { %1410 = sst [smem:[#allocation12_spill]] %s1437_s7  ;;  %p1217_p7 = por %p56_p6, %p55_p5 }
  0x14   : > { %s37_s13 = ssub.s32 %s1097_s27, %s1437_s7  ;;  %p163_p9 = scmp.eq.s32.totalorder %s749_s29, 3 }
  0x15   : > { %s39_s14 = sor.u32 %s38_s9, %s37_s13  ;;  %p150_p10 = scmp.eq.s32.totalorder %s37_s13, 0 }
  0x16   : > { %p40_p11 = scmp.eq.s32.totalorder %s39_s14, 0  ;;  %p1225_p12 = por %p163_p9, %p162_p8 }
  0x17   : > { %s1230_s16 = scalar_select %p150_p10, %s1069_s20, %s152_s11  }
  0x18   : > { %s1412_s15 = scalar_select %p1225_p12, 1, 0 }
  0x19   : > { %1413 = sst [smem:[#allocation13_spill]] %s1230_s16  ;;  %p168_p13 = scmp.ne.s32.totalorder %s1065_s19, %s1061_s18 }
  0x1a   : > { %s1233_s17 = scalar_select %p40_p11, %s1081_s23, %s42_s8  }
  0x1b   : > { %p169_p0 = scmp.eq.s32.totalorder %s750_s30, 3  ;;  %p835_p1 = scmp.lt.s32.totalorder %s1101_s28, 4 }
  0x1c   : > { %1414 = sst [smem:[#allocation14_spill]] %s1233_s17  ;;  %s201_s7 = sand.u32 1, %s1081_s23  }
  0x1d   : > { %p1238_p2 = por %p169_p0, %p168_p13  ;;  %s814_s29 = smul.u32 24, %s201_s7 }
  0x1e   : > { %s815_s9 = smul.u32 6, %s1097_s27  ;;  %p1246_p4 = pnand %p835_p1, %p1209_p3 }
  0x1f   : > { %s1415_s21 = scalar_select %p1238_p2, 1, 0 }
  0x20   : > { %s210_s11 = sadd.s32 %s1093_s26, %s815_s9  ;;  %s205_s8 = scalar_lea.vmem [#allocation4], %s814_s29 }
  0x21   : > { %s213_s14 = sshll.u32 %s205_s8, 4  ;;  %s753_s6 = sshll.u32 %s210_s11, 7  ;;  %s1251_s14 = int_to_ptr.vmem [resolvable:$true] %s213_s14 }
  0x22   : > { %s1256_s16 = scalar_lea.hbm %s1397_s0, %s753_s6  ;;  %s1258_s10 = scalar_lea.sflag [#allocation5], %s201_s7 }
  0x23   : > { %s949_s27 = scalar_lea.hbm %s1256_s16, 384  ;;  %p951_p5 = pneg %p1246_p4 }
  0x24   : > { %p950_p3 = scmp.ne.s32.totalorder %s1256_s16, %s949_s27  ;;  %s954_s17 = scalar_lea.hbm %s1397_s0, 1536 }
  0x25   : > { %p955_p9 = scmp.lt.u32.totalorder %s1256_s16, %s1397_s0  ;;  %p956_p10 = scmp.lt.u32.totalorder %s954_s17, %s949_s27 }
  0x26   : > { %p952_p6 = pnand %p951_p5, %p950_p3  ;;  %p958_p13 = scmp.lt.u32.totalorder %s949_s27, %s1256_s16 }
  0x27   : > { %p957_p11 = por %p956_p10, %p955_p9 }
  0x28   : > { %p953_p8 = pneg %p952_p6 }
  0x29   : > { %p959_p0 = por %p958_p13, %p957_p11 }
  0x2b   : > { %p960_p1 = pnand %p959_p0, %p953_p8 }
  0x2d   : > { %963 = shalt.err (!%p960_p1)
}
  0x2e   : > { %s964_s7 = scalar_lea.vmem %s1251_s14, 384  ;;  %s1103_s8 = smov [#allocation4]  }
  0x2f   : > { %p965_p3 = scmp.ne.s32.totalorder %s1251_s14, %s964_s7  ;;  %s969_s30 = sshll.u32 %s1103_s8, 4  ;;  %s970_s30 = int_to_ptr.vmem [resolvable:$false] %s969_s30 }
  0x30   : > { %s971_s29 = scalar_lea.vmem %s970_s30, 768  ;;  %p972_p12 = scmp.lt.s32.totalorder %s1251_s14, %s970_s30 }
  0x31   : > { %p967_p6 = pnand %p965_p3, %p951_p5  ;;  %p973_p9 = scmp.lt.s32.totalorder %s971_s29, %s964_s7 }
  0x33   : > { %p968_p2 = pneg %p967_p6  ;;  %p974_p10 = por %p973_p9, %p972_p12 }
  0x35   : > { %p975_p11 = pnand %p974_p10, %p968_p2 }
  0x37   : > { %978 = shalt.err (!%p975_p11)
}
  0x38   : > { %s1104_s27 = smov 256   ;;  %s1105_s9 = smov 128  }
  0x39   : > { %s1106_s17 = smov 8   ;;  %p754_p5 = scmp.ge.s32.totalorder %s1101_s28, 1 }
  0x3a   : > { %830 = dma.hbm_to_vmem [thread:$0]  (!%p1246_p4), %s1256_s16, 384, %s1251_s14, %s1258_s10, %s1104_s27, %s1105_s9, %s1106_s17  }
  0x3b   : > { %p221_p8 = scmp.lt.s32.totalorder %s1101_s28, 5 }
  0x3d   : > { %p222_p13 = pnand %p754_p5, %p221_p8 }
  0x3e   : > { %s227_s6 = sand.u32 (!%p222_p13), 1, %s1077_s22  }
  0x3f   : > { %225 = sbr.rel (%p222_p13) target bundleno = 1067 (0x42b), region = 40  ;;  %s228_s7 = scalar_lea.sflag (!%p222_p13), [#allocation5], %s227_s6 }
  0x40   : > { %s816_s11 = smul.u32 (!%p222_p13), 24, %s227_s6 }
  0x42   : > { %s231_s8 = scalar_lea.vmem (!%p222_p13), [#allocation4], %s816_s11 }
  0x46   : > { %1052 = dma.done.wait (%p1217_p7), %s228_s7, 384  }
  0x47   : > { %1054 = vsyncadd (%p1217_p7), %s228_s7, 4294966912  ;;  %s255_s13 = sand.u32 1, %s1065_s19   ;;  %v1107_v0 = vmov 0   ;;  %s756_s14 = sshll.u32 %s1085_s24, 7  ;;  %v260_v1 = vld [vmem:[%s231_s8] sm:$0xff]  ;;  %v261_v2 = vld [vmem:[%s231_s8 + $0x8] sm:$0xff] }
  0x48   : > { %933 = vset.pattern.permute.xlu0 %v1107_v0  ;;  %934 = vset.pattern.permute.xlu1 %v1107_v0  ;;  %s755_s16 = sshll.u32 %s255_s13, 4  ;;  %v262_v3 = vld [vmem:[%s231_s8 + $0x10] sm:$0xff]  ;;  %s1297_s10 = sshra.s32 %s756_s14, 7  ;;  %vm302_vm0 = vcmask 195584   ;;  %v263_v4 = vadd.f32 %v261_v2, %v260_v1  ;;  %v274_v5 = vpack.c.bf16 %v261_v2, %v260_v1  ;;  %vm309_vm1 = vcmask 1043456   ;;  %v278_v10 = vld [vmem:[%s1399_s2 + $0x10] sm:$0xff] }
  0x49   : > { %s757_s12 = sshll.u32 %s1297_s10, 3  ;;  %v275_v6 = vpack.c.bf16 %v262_v3, %v262_v3  ;;  %v935_v7 = vld [vmem:[%s1398_s1] sm:$0xff]   ;;  %s1310_s11 = scalar_lea.vmem [#allocation7], %s755_s16  ;;  %v277_v13 = vld [vmem:[%s1399_s2 + $0x8] sm:$0xff]  ;;  %291 = vperm.xlu1 %934, %v278_v10  }
  0x4a   : > { %v276_v8 = vld [vmem:[%s1399_s2] sm:$0xff]  ;;  %v264_v9 = vadd.f32 %v263_v4, %v262_v3  ;;  %788 = vmatprep.subr.bf16.mxu0 %v274_v5  ;;  %792 = vmatprep.mubr.msk.bf16.mxu0 %vm302_vm0, %v935_v7  ;;  %s269_s7 = scalar_lea.vmem %s1310_s11, %s757_s12 [#allocation7]  ;;  %v936_v14 = vld [vmem:[%s1398_s1 + $0x8] ss:$0 sps:$4 sm:$0xff]   ;;  %s762_s16 = sshll.u32 %s1297_s10, 2 }
  0x4b   : > { %789 = vmatpush3.bf16.msra.mxu0 %v274_v5  ;;  %281 = vperm.xlu0 %933, %v276_v8   ;;  %v311_v12 = vsel %vm309_vm1, %v275_v6, 0  ;;  %s378_s12 = scalar_lea.vmem [#allocation2], %s762_s16  ;;  %p767_p7 = scmp.ne.s32.totalorder %s1085_s24, 0 }
  0x4c   : > { %v265_v11 = vmul.f32 0.33333334, %v264_v9  ;;  %813 = vmatprep.subr.msk.bf16.mxu0 %vm309_vm1, %v275_v6  ;;  %vm394_vm2 = vcmask (!%p767_p7), 7168   ;;  %v1108_v43 = vmov (!%p767_p7), 0.0  }
  0x4d   : > { %395 = vst.msk [vmem:[#allocation3] sm:$0xff] (!%p767_p7), %vm394_vm2, %v1108_v43  ;;  %396 = vst.msk [vmem:[#allocation3 + $0x8] sm:$0xff] (!%p767_p7), %vm394_vm2, %v1108_v43 }
  0x4e   : > { %270 = vst [vmem:[%s269_s7] sm:$0xff] %v265_v11  ;;  %397 = vst.msk [vmem:[#allocation3 + $0x10] sm:$0xff] (!%p767_p7), %vm394_vm2, %v1108_v43 }
  0x4f   : > { %791 = vmatpush3.bf16.msra.mxu0 %v311_v12  ;;  %286 = vperm.xlu0 %933, %v277_v13  }
  0x52   : > { %793 = vmatmul.mubr.msk.bf16.vlgmr.msra.gmra.mrb[0].mxu0 %vm302_vm0, %v936_v14 }
  0xc8   : > { %v292_v16 = vpop.permute.xlu1 %291 }
  0xca   : > { %v282_v15 = vpop.permute.xlu0 %281 }
  0xce   : > { %v287_v22 = vpop.permute.xlu0 %286 }
 0x125   : > { %v794_v17 = vpop.f32.mrb[0].mxu0 }
 0x126   : > { %v356_v18 = vadd.f32 %v794_v17, %v292_v16  ;;  %v347_v19 = vpop.f32.mrb[1].mxu0 }
 0x127   : > { %v348_v20 = vadd.f32 %v347_v19, %v282_v15  ;;  %v795_v21 = vpop.f32.mrb[2].mxu0 }
 0x128   : > { %v366_v23 = vmul.f32 0.70710677, %v356_v18  ;;  %v350_v24 = vpop.f32.mrb[3].mxu0  ;;  %v363_v30 = vmul.f32 0.5, %v356_v18 }
 0x129   : > { %v364_v25 = vmul.f32 0.70710677, %v348_v20  ;;  %v351_v26 = vadd.f32 %v350_v24, %v287_v22  ;;  %v361_v32 = vmul.f32 0.5, %v348_v20 }
 0x12a   : > { %937 = verf.f32 %v366_v23 }
 0x12b   : > { %939 = verf.f32 %v364_v25  ;;  %v365_v27 = vmul.f32 0.70710677, %v351_v26  ;;  %v362_v37 = vmul.f32 0.5, %v351_v26 }
 0x12d   : > { %941 = verf.f32 %v365_v27 }
 0x134   : > { %v938_v28 = vpop.eup %937 }
 0x135   : > { %v940_v29 = vpop.eup %939  ;;  %v372_v31 = vadd.f32 1.0, %v938_v28 }
 0x136   : > { %v370_v33 = vadd.f32 1.0, %v940_v29 }
 0x137   : > { %v942_v34 = vpop.eup %941  ;;  %v375_v35 = vmul.f32 %v372_v31, %v363_v30 }
 0x138   : > { %v373_v36 = vmul.f32 %v370_v33, %v361_v32  ;;  %v371_v38 = vadd.f32 1.0, %v942_v34  ;;  %393 = sbr.rel (%p767_p7) target bundleno = 319 (0x13f), region = 48 }
 0x139   : > { %v385_v39 = vpack.c.bf16 %v375_v35, %v375_v35 }
 0x13a   : > { %v376_v40 = vpack.c.bf16 %v373_v36, %v373_v36  ;;  %v374_v41 = vmul.f32 %v371_v38, %v362_v37 }
 0x13b   : > { %766 = vst [vmem:[%s378_s12 + $0x10] sm:$0xf] %v385_v39 }
 0x13c   : > { %379 = vst [vmem:[%s378_s12] sm:$0xf] %v376_v40  ;;  %v380_v42 = vpack.c.bf16 %v374_v41, %v374_v41 }
 0x13e   : > { %764 = vst [vmem:[%s378_s12 + $0x8] sm:$0xf] %v380_v42 }
 0x13f PF: > { %401 = vadd.xlane.f32.xlu0 %v373_v36  ;;  %405 = vadd.xlane.f32.xlu1 %v375_v35  ;;  %v398_v44 = vld [vmem:[#allocation3] sm:$0xff]  ;;  %v400_v45 = vld [vmem:[#allocation3 + $0x10] sm:$0xff]  ;;  %vm410_vm3 = vcmask 7168   ;;  %v399_v50 = vld [vmem:[#allocation3 + $0x8] sm:$0xff]  ;;  %p768_p12 = scmp.ne.s32.totalorder %s1085_s24, 1 }
 0x140   : > { %v1109_v55 = vmov (!%p768_p12), 0.0|0.0   ;;  %vm1110_vm4 = vmmov (!%p768_p12), 0   ;;  %v1111_v58 = vmov (!%p768_p12), 0.0   ;;  %v424_v62 = vld [vmem:[%s1400_s3] sm:$0x3] (!%p768_p12)  ;;  %vm508_vm5 = vcmask (!%p768_p12), 1041408  }
 0x141   : > { %810 = vmatprep.subr.bf16.mxu0 (!%p768_p12), %v1109_v55  ;;  %802 = vmatprep.mubr.msk.f32.mxu0 (!%p768_p12), %vm1110_vm4, %v1111_v58  ;;  %v503_v6 = vld [vmem:[%s1401_s4] sm:$0x7] (!%p768_p12)  ;;  %vm504_vm6 = vcmask (!%p768_p12), 15360   ;;  %vm582_vm7 = vcmask (!%p768_p12), 2048  }
 0x142   : > { %805 = vmatprep.subr.mxu1 (!%p768_p12), %v1111_v58  ;;  %807 = vmatprep.mubr.msk.f32.mxu1 (!%p768_p12), %vm1110_vm4, %v1111_v58 }
 0x143   : > { %403 = vadd.xlane.f32.xlu0 %v374_v41 }
 0x145   : > { %v602_v30 = vld [vmem:[#allocation2] sm:$0xff] (!%p768_p12)  ;;  %v612_v31 = vld [vmem:[#allocation2 + $0x8] sm:$0xff] (!%p768_p12)  ;;  %v624_v33 = vld [vmem:[#allocation2 + $0x10] sm:$0xff] (!%p768_p12) }
 0x146   : > { %v603_v32 = vunpack.c.l.bf16 (!%p768_p12), %v602_v30  ;;  %v604_v34 = vunpack.c.h.bf16 (!%p768_p12), %v602_v30  ;;  %v613_v35 = vunpack.c.l.bf16 (!%p768_p12), %v612_v31  ;;  %v614_v36 = vunpack.c.h.bf16 (!%p768_p12), %v612_v31 }
 0x147   : > { %v625_v38 = vunpack.c.l.bf16 (!%p768_p12), %v624_v33  ;;  %v626_v39 = vunpack.c.h.bf16 (!%p768_p12), %v624_v33 }
 0x1cc   : > { %v402_v46 = vpop.xlane.xlu0 %401  ;;  %v406_v47 = vpop.xlane.xlu1 %405 }
 0x1cd   : > { %v407_v48 = vadd.f32 %v402_v46, %v398_v44  ;;  %v409_v49 = vadd.f32 %v406_v47, %v400_v45  ;;  %417 = sbr.rel (%p768_p12) target bundleno = 1042 (0x412), region = 52 }
 0x1cf   : > { %411 = vst.msk [vmem:[#allocation3] sm:$0xff] %vm410_vm3, %v407_v48  ;;  %413 = vst.msk [vmem:[#allocation3 + $0x10] sm:$0xff] %vm410_vm3, %v409_v49 }
 0x1d0   : > { %v404_v51 = vpop.xlane.xlu0 %403 }
 0x1d1   : > { %v408_v52 = vadd.f32 %v404_v51, %v399_v50  ;;  %v635_v50 = vld [vmem:[%s1310_s11] sm:$0xff] (!%p768_p12)  ;;  %v636_v51 = vld [vmem:[%s1310_s11 + $0x8] sm:$0xff] (!%p768_p12) }
 0x1d3   : > { %412 = vst.msk [vmem:[#allocation3 + $0x8] sm:$0xff] %vm410_vm3, %v408_v52 }
 0x1d6   : > { %v418_v53 = vld [vmem:[#allocation3] sm:$0xff]  ;;  %v420_v59 = vld [vmem:[#allocation3 + $0x10] sm:$0xff] }
 0x1d7   : > { %v421_v56 = vmul.f32 0.00390625, %v418_v53  ;;  %v423_v61 = vmul.f32 0.00390625, %v420_v59 }
 0x1da   : > { %v419_v54 = vld [vmem:[#allocation3 + $0x8] sm:$0xff] }
 0x1db   : > { %v422_v57 = vmul.f32 0.00390625, %v419_v54 }
 0x1dd   : > { %v811_v60 = vpack.c.bf16 %v422_v57, %v421_v56 }
 0x1df   : > { %812 = vmatpush3.bf16.msra.mxu0 %v811_v60 }
 0x1e0   : > { %800 = vmatprep.subr.mxu0 %v1111_v58 }
 0x1e3   : > { %801 = vmatpush3.msra.mxu0 %v423_v61 }
 0x1e4   : > { %803 = vmatmul.mubr.msk.f32.vlgmr.msra.gmra.mrb[0].mxu0 %vm302_vm0, %v424_v62 }
 0x2b7   : > { %v494_v63 = vpop.f32.mrb[0].mxu0 }
 0x2b8   : > { %v499_v0 = vmul.f32 0.70710677, %v494_v63  ;;  %v804_v1 = vpop.f32.mrb[1].mxu0  ;;  %v498_v3 = vmul.f32 0.5, %v494_v63 }
 0x2ba   : > { %943 = verf.f32 %v499_v0 }
 0x2c4   : > { %v944_v2 = vpop.eup %943 }
 0x2c5   : > { %v501_v4 = vadd.f32 1.0, %v944_v2 }
 0x2c7   : > { %v502_v5 = vmul.f32 %v501_v4, %v498_v3 }
 0x2c9   : > { %806 = vmatpush3.msk.msra.mxu1 %vm508_vm5, %v502_v5 }
 0x2ca   : > { %808 = vmatmul.mubr.msk.f32.vlgmr.msra.gmra.mrb[0].mxu1 %vm504_vm6, %v503_v6 }
 0x39d   : > { %v578_v7 = vpop.f32.mrb[0].mxu1 }
 0x39e   : > { %v583_v8 = vsel %vm582_vm7, %v578_v7, -inf  ;;  %v809_v9 = vpop.f32.mrb[1].mxu1 }
 0x39f   : > { %v584_v10 = vrot.slane %v583_v8, 4 }
 0x3a1   : > { %v585_v11 = vmax.f32 %v583_v8, %v584_v10 }
 0x3a3   : > { %v586_v12 = vrot.slane %v585_v11, 2 }
 0x3a5   : > { %v587_v13 = vmax.f32 %v585_v11, %v586_v12 }
 0x3a7   : > { %v588_v14 = vrot.slane %v587_v13, 1 }
 0x3a9   : > { %v589_v15 = vmax.f32 %v587_v13, %v588_v14 }
 0x3ab   : > { %v590_v16 = vsub.f32 %v578_v7, %v589_v15 }
 0x3ad   : > { %v591_v17 = vmul.f32 1.442695, %v590_v16 }
 0x3af   : > { %945 = vpow2.f32 %v591_v17 }
 0x3b9   : > { %v946_v18 = vpop.eup %945 }
 0x3ba   : > { %v593_v19 = vsel %vm582_vm7, %v946_v18, 0.0 }
 0x3bb   : > { %v594_v20 = vrot.slane %v593_v19, 4 }
 0x3bd   : > { %v595_v21 = vadd.f32 %v594_v20, %v593_v19 }
 0x3bf   : > { %v596_v22 = vrot.slane %v595_v21, 2 }
 0x3c1   : > { %v597_v23 = vadd.f32 %v596_v22, %v595_v21 }
 0x3c3   : > { %v598_v24 = vrot.slane %v597_v23, 1 }
 0x3c5   : > { %v599_v25 = vadd.f32 %v598_v24, %v597_v23 }
 0x3c7   : > { %947 = vrcp.f32 %v599_v25 }
 0x3d1   : > { %v948_v26 = vpop.eup %947 }
 0x3d2   : > { %v601_v27 = vmul.f32 %v948_v26, %v946_v18 }
 0x3d4   : > { %817 = vpush %v601_v27  ;;  %v615_v28 = vrot.slane %v601_v27, 1  ;;  %v627_v29 = vrot.slane %v601_v27, 2 }
 0x3d6   : > { %819 = vpush %v615_v28 }
 0x3d7   : > { %821 = vpush %v627_v29 }
 0x405   : > { %s818_s17 = spop %817 }
 0x406   : > { %v607_v37 = vstv %s818_s17 }
 0x407   : > { %s820_s6 = spop %819  ;;  %v609_v40 = vmul.f32 %v607_v37, %v603_v32  ;;  %v610_v42 = vmul.f32 %v607_v37, %v604_v34 }
 0x408   : > { %v617_v41 = vstv %s820_s6  ;;  %s822_s7 = spop %821 }
 0x409   : > { %v619_v43 = vmul.f32 %v617_v41, %v613_v35  ;;  %v620_v44 = vmul.f32 %v617_v41, %v614_v36  ;;  %v629_v45 = vstv %s822_s7 }
 0x40a   : > { %v631_v48 = vmul.f32 %v629_v45, %v625_v38  ;;  %v632_v49 = vmul.f32 %v629_v45, %v626_v39 }
 0x40b   : > { %v621_v46 = vadd.f32 %v619_v43, %v609_v40  ;;  %v622_v47 = vadd.f32 %v620_v44, %v610_v42 }
 0x40d   : > { %v633_v52 = vadd.f32 %v631_v48, %v621_v46  ;;  %v634_v53 = vadd.f32 %v632_v49, %v622_v47 }
 0x40f   : > { %v637_v54 = vadd.f32 %v635_v50, %v633_v52  ;;  %v638_v55 = vadd.f32 %v636_v51, %v634_v53 }
 0x411   : > { %639 = vst [vmem:[%s1310_s11] sm:$0xff] %v637_v54  ;;  %640 = vst [vmem:[%s1310_s11 + $0x8] sm:$0xff] %v638_v55 }
 0x412 PF: > { %s777_s8 = sshll.u32 %s1089_s25, 8  ;;  %s656_s16 = sshll.u32 %s1310_s11, 4  ;;  %s657_s16 = int_to_ptr.vmem [resolvable:$true] %s656_s16 }
 0x413   : > { %s1338_s29 = scalar_lea.hbm %s1402_s5, %s777_s8  ;;  %s642_s12 = scalar_lea.sflag [#allocation6], %s255_s13 }
 0x414   : > { %s979_s10 = scalar_lea.vmem %s657_s16, 256  ;;  %p1417_p4 = scmp.ne.s32.totalorder %s1412_s15, 0 }
 0x415   : > { %p980_p2 = scmp.ne.s32.totalorder %s657_s16, %s979_s10  ;;  %s1112_s27 = smov [#allocation7]  }
 0x416   : > { %s983_s24 = sshll.u32 %s1112_s27, 4  ;;  %s984_s24 = int_to_ptr.vmem [resolvable:$false] %s983_s24 }
 0x417   : > { %p981_p0 = pnand %p980_p2, %p1417_p4  ;;  %s985_s9 = scalar_lea.vmem %s984_s24, 512 }
 0x418   : > { %p986_p3 = scmp.lt.s32.totalorder %s657_s16, %s984_s24  ;;  %p987_p6 = scmp.lt.s32.totalorder %s985_s9, %s979_s10 }
 0x419   : > { %p982_p1 = pneg %p981_p0 }
 0x41a   : > { %p988_p9 = por %p987_p6, %p986_p3 }
 0x41c   : > { %p989_p10 = pnand %p988_p9, %p982_p1 }
 0x41e   : > { %992 = shalt.err (!%p989_p10)
}
 0x41f   : > { %s993_s25 = scalar_lea.hbm %s1338_s29, 256  ;;  %s997_s17 = scalar_lea.hbm %s1402_s5, 512 }
 0x420   : > { %p994_p11 = scmp.ne.s32.totalorder %s1338_s29, %s993_s25  ;;  %p998_p13 = scmp.lt.u32.totalorder %s1338_s29, %s1402_s5 }
 0x421   : > { %p999_p7 = scmp.lt.u32.totalorder %s997_s17, %s993_s25  ;;  %p1001_p2 = scmp.lt.u32.totalorder %s993_s25, %s1338_s29 }
 0x422   : > { %p995_p5 = pnand %p994_p11, %p1417_p4 }
 0x423   : > { %p1000_p12 = por %p999_p7, %p998_p13 }
 0x424   : > { %p996_p8 = pneg %p995_p5 }
 0x425   : > { %p1002_p0 = por %p1001_p2, %p1000_p12 }
 0x427   : > { %p1003_p1 = pnand %p1002_p0, %p996_p8 }
 0x429   : > { %1006 = shalt.err (!%p1003_p1)
}
 0x42a   : > { %825 = dma.vmem_to_hbm [thread:$0]  (%p1417_p4), %s657_s16, 256, %s1338_s29, %s642_s12  }
 0x42b PF: > { %p836_p3 = scmp.ge.s32.totalorder %s1101_s28, 2  ;;  %s668_s8 = sand.u32 1, %s1061_s18  }
 0x42c   : > { %p1418_p6 = scmp.ne.s32.totalorder %s1415_s21, 0  ;;  %s669_s14 = scalar_lea.sflag [#allocation6], %s668_s8 }
 0x42e   : > { %p832_p9 = pnand %p836_p3, %p1418_p6 }
 0x430   : > { %1056 = dma.done.wait (!%p832_p9), %s669_s14, 256  }
 0x431   : > { %1058 = vsyncadd (!%p832_p9), %s669_s14, 4294967040  ;;  %s21_s28 = sadd.s32 1, %s1101_s28   ;;  %s1419_s30 = sld [smem:[#allocation13_spill]] }
 0x432   : > { %p18_p10 = scmp.ge.s32.totalorder %s21_s28, 6   ;;  %s1420_s15 = sld [smem:[#allocation14_spill]] }
 0x433   : > { %s1421_s25 = sld [smem:[#allocation10_spill]]  ;;  %s1422_s29 = sld [smem:[#allocation11_spill]] }
 0x434   : > { %s1423_s27 = sld [smem:[#allocation12_spill]]  ;;  %s1424_s18 = smov %s1065_s19 }
 0x435   : > { %s1425_s19 = smov %s1069_s20  ;;  %s1427_s21 = smov %s1077_s22 }
 0x436   : > { %s1428_s22 = smov %s1081_s23  ;;  %s1430_s24 = smov %s1093_s26 }
 0x437   : > { %s1426_s20 = smov %s1419_s30  ;;  %20 = sbr.rel (!%p18_p10) target bundleno = 9 (0x9), region = 99 }
 0x438   : > { %s1429_s23 = smov %s1420_s15 }
 0x439   : > { %s1431_s26 = smov %s1422_s29 }
 0x43e   :  { %674 = vsyncpa [#allocation5], 1 }
 0x43f   :  { %676 = vsyncpa [#allocation5 + $0x1], 1 }
 0x440   :  { %677 = vsyncpa [#allocation6], 1 }
 0x441   :  { %679 = vsyncpa [#allocation6 + $0x1], 1 }

</bundles_post_ra>
